<compile_context>
chip_gen: v7x
topology: tpu7x:2x2x1
jax: 0.10.0
libtpu: 0.0.40
codegen_flags: <defaults>
</compile_context>

<pallas_src>
import functools

import jax
import jax.numpy as jnp
import numpy as np
from jax.experimental import pallas as pl
from jax.experimental.pallas import tpu as pltpu


def _round_up(x, m):
    return ((x + m - 1) // m) * m


def mlp_kernel(x_ref, w1_ref, b1_ref, w2_ref, b2_ref, w3_ref, b3_ref, o_ref):
    # Layer 1: Linear + ReLU   (f32 accumulation on the MXU)
    z1 = jnp.dot(x_ref[...], w1_ref[...], preferred_element_type=jnp.float32)
    z1 = z1 + b1_ref[...]                      # (1, H) broadcasts over batch rows
    h1 = jnp.maximum(z1, 0.0)

    # Layer 2: Linear + LeakyReLU(0.1) -- single VALU max instead of compare+select
    z2 = jnp.dot(h1, w2_ref[...], preferred_element_type=jnp.float32)
    z2 = z2 + b2_ref[...]
    h2 = jnp.maximum(z2, 0.1 * z2)

    # Layer 3: Linear (logits), lane-dense store (last dim padded to 128 in wrapper)
    z3 = jnp.dot(h2, w3_ref[...], preferred_element_type=jnp.float32)
    z3 = z3 + b3_ref[...]
    o_ref[...] = z3.astype(o_ref.dtype)


def _mlp_pallas(x_p, w1_p, b1_p, w2_p, b2_p, w3_p, b3_p, *, block_b):
    B_p, IN_p = x_p.shape
    H_p = w1_p.shape[1]
    C_p = w3_p.shape[1]
    grid = (B_p // block_b,)

    # Explicit VMEM budget (weights are double-buffered by the pipeline by default;
    # budget conservatively and leave headroom). Important on v7x (64 MiB VMEM,
    # 32 MiB default scoped limit).
    dtype_bytes = 4
    weight_bytes = (IN_p * H_p + H_p * H_p + H_p * C_p + 2 * H_p + C_p) * dtype_bytes
    io_bytes = block_b * (IN_p + C_p) * dtype_bytes
    vmem_limit = int(2 * (weight_bytes + io_bytes) * 1.5)
    vmem_limit = min(max(vmem_limit, 32 * 1024 * 1024), 100 * 1024 * 1024)

    return pl.pallas_call(
        mlp_kernel,
        out_shape=jax.ShapeDtypeStruct((B_p, C_p), x_p.dtype),
        grid_spec=pltpu.PrefetchScalarGridSpec(
            num_scalar_prefetch=0,
            grid=grid,
            in_specs=[
                pl.BlockSpec((block_b, IN_p), lambda i: (i, 0)),  # x tile
                pl.BlockSpec((IN_p, H_p), lambda i: (0, 0)),      # w1 (resident, const index)
                pl.BlockSpec((1, H_p), lambda i: (0, 0)),         # b1
                pl.BlockSpec((H_p, H_p), lambda i: (0, 0)),       # w2
                pl.BlockSpec((1, H_p), lambda i: (0, 0)),         # b2
                pl.BlockSpec((H_p, C_p), lambda i: (0, 0)),       # w3
                pl.BlockSpec((1, C_p), lambda i: (0, 0)),         # b3
            ],
            out_specs=pl.BlockSpec((block_b, C_p), lambda i: (i, 0)),
        ),
        compiler_params=pltpu.CompilerParams(
            dimension_semantics=("parallel",),
            vmem_limit_bytes=vmem_limit,
        ),
    )(x_p, w1_p, b1_p, w2_p, b2_p, w3_p, b3_p)


@jax.jit
def mlp_forward(x, w1, b1, w2, b2, w3, b3):
    """Pad all dims to MXU/lane-friendly sizes, run the fused MLP kernel, slice back."""
    B, IN = x.shape
    H = w1.shape[1]
    C = w3.shape[1]

    # Lane/sublane-aligned padded sizes: feature/hidden/class dims -> multiples of 128
    # (lane-dense loads, full MXU lanes, unmasked stores); batch -> multiple of 8 (f32
    # sublane), processed in one grid step when small, 256-row tiles when large.
    IN_p = _round_up(IN, 128)
    H_p = _round_up(H, 128)
    C_p = _round_up(C, 128)

    B_p = _round_up(B, 8)
    if B_p <= 512:
        block_b = B_p                    # whole batch in one grid step
    else:
        block_b = 256                    # large-batch tiling, even # of steps for 2-TC chips
        B_p = _round_up(B_p, block_b)

    f32 = jnp.float32
    x_p = jnp.zeros((B_p, IN_p), f32).at[:B, :IN].set(x.astype(f32))
    w1_p = jnp.zeros((IN_p, H_p), f32).at[:IN, :H].set(w1.astype(f32))
    b1_p = jnp.zeros((1, H_p), f32).at[:, :H].set(b1.astype(f32))
    w2_p = jnp.zeros((H_p, H_p), f32).at[:H, :H].set(w2.astype(f32))
    b2_p = jnp.zeros((1, H_p), f32).at[:, :H].set(b2.astype(f32))
    w3_p = jnp.zeros((H_p, C_p), f32).at[:H, :C].set(w3.astype(f32))
    b3_p = jnp.zeros((1, C_p), f32).at[:, :C].set(b3.astype(f32))
    # Zero padding is exact: padded hidden lanes stay 0 through ReLU/LeakyReLU and the
    # zero-padded weight rows contribute nothing; padded batch rows / class lanes are
    # sliced off below.

    # TODO(synk): for hidden sizes where full (H_p, H_p) weights no longer fit VMEM
    # (e.g. >~2k f32 on v7x), add a K-reduction grid axis with an f32 accumulator
    # and pl.when init/finalize instead of resident full-weight blocks.
    out_p = _mlp_pallas(x_p, w1_p, b1_p, w2_p, b2_p, w3_p, b3_p, block_b=block_b)

    return out_p[:B, :C].astype(x.dtype)


def init_linear_params(key, fan_in, fan_out):
    """Deterministic init mimicking PyTorch nn.Linear default (uniform +/- 1/sqrt(fan_in)).
    Weight returned as (fan_in, fan_out) for the x @ W layout."""
    kw, kb = jax.random.split(key)
    bound = 1.0 / np.sqrt(fan_in)
    w = jax.random.uniform(kw, (fan_in, fan_out), jnp.float32, -bound, bound)
    b = jax.random.uniform(kb, (1, fan_out), jnp.float32, -bound, bound)
    return w, b


def mlp_reference(x, w1, b1, w2, b2, w3, b3):
    h1 = jnp.maximum(x @ w1 + b1, 0.0)
    z2 = h1 @ w2 + b2
    h2 = jnp.where(z2 > 0.0, z2, 0.1 * z2)
    return h2 @ w3 + b3


if __name__ == "__main__":
    # Small shapes consistent with the module: batch=16, in_features=32,
    # hidden_size=32, num_classes=16.
    B, IN, H, C = 16, 32, 32, 16

    key = jax.random.PRNGKey(0)
    kx, k1, k2, k3 = jax.random.split(key, 4)

    x = jax.random.normal(kx, (B, IN), jnp.float32)
    w1, b1 = init_linear_params(k1, IN, H)
    w2, b2 = init_linear_params(k2, H, H)
    w3, b3 = init_linear_params(k3, H, C)

    out = mlp_forward(x, w1, b1, w2, b2, w3, b3)
    out = jax.block_until_ready(out)

    ref = mlp_reference(x, w1, b1, w2, b2, w3, b3)
    np.testing.assert_allclose(np.asarray(out), np.asarray(ref), rtol=1e-5, atol=1e-5)

    print("KERNEL_OK")
</pallas_src>

<mosaic_0001>
module attributes {stable_mosaic.version = 11 : i64} {
  func.func @mlp_kernel(%arg0: i32, %arg1: memref<16x128xf32, #tpu.memory_space<vmem>>, %arg2: memref<128x128xf32, #tpu.memory_space<vmem>>, %arg3: memref<1x128xf32, #tpu.memory_space<vmem>>, %arg4: memref<128x128xf32, #tpu.memory_space<vmem>>, %arg5: memref<1x128xf32, #tpu.memory_space<vmem>>, %arg6: memref<128x128xf32, #tpu.memory_space<vmem>>, %arg7: memref<1x128xf32, #tpu.memory_space<vmem>>, %arg8: memref<16x128xf32, #tpu.memory_space<vmem>>) attributes {dimension_semantics = [#tpu.dimension_semantics<parallel>], iteration_bounds = array<i64: 1>, scalar_prefetch = 0 : i64, scratch_operands = 0 : i64, tpu.core_type = #tpu.core_type<tc>, window_params = [{transform_indices = @transform_0, window_bounds = array<i64: 16, 128>}, {pipeline_mode = #tpu.pipeline_mode<synchronous>, transform_indices = @transform_1, window_bounds = array<i64: 128, 128>}, {pipeline_mode = #tpu.pipeline_mode<synchronous>, transform_indices = @transform_2, window_bounds = array<i64: 1, 128>}, {pipeline_mode = #tpu.pipeline_mode<synchronous>, transform_indices = @transform_3, window_bounds = array<i64: 128, 128>}, {pipeline_mode = #tpu.pipeline_mode<synchronous>, transform_indices = @transform_4, window_bounds = array<i64: 1, 128>}, {pipeline_mode = #tpu.pipeline_mode<synchronous>, transform_indices = @transform_5, window_bounds = array<i64: 128, 128>}, {pipeline_mode = #tpu.pipeline_mode<synchronous>, transform_indices = @transform_6, window_bounds = array<i64: 1, 128>}, {transform_indices = @transform_7, window_bounds = array<i64: 16, 128>}]} {
    %c0 = arith.constant 0 : index
    %c0_0 = arith.constant 0 : index
    %0 = vector.load %arg1[%c0, %c0_0] : memref<16x128xf32, #tpu.memory_space<vmem>>, vector<16x128xf32>
    %c0_1 = arith.constant 0 : index
    %c0_2 = arith.constant 0 : index
    %1 = vector.load %arg2[%c0_1, %c0_2] : memref<128x128xf32, #tpu.memory_space<vmem>>, vector<128x128xf32>
    %cst = arith.constant dense<0.000000e+00> : vector<16x128xf32>
    %2 = tpu.matmul %0, %1, %cst {dimension_numbers = #tpu.dot_dimension_numbers<[1], [0], [0], [1], [0, 0, 1, 1], [], []>} : vector<16x128xf32>, vector<128x128xf32>, vector<16x128xf32> -> vector<16x128xf32>
    %c0_3 = arith.constant 0 : index
    %c0_4 = arith.constant 0 : index
    %3 = vector.load %arg3[%c0_3, %c0_4] : memref<1x128xf32, #tpu.memory_space<vmem>>, vector<1x128xf32>
    %4 = vector.broadcast %3 : vector<1x128xf32> to vector<16x128xf32>
    %5 = arith.addf %2, %4 : vector<16x128xf32>
    %cst_5 = arith.constant 0.000000e+00 : f32
    %6 = vector.broadcast %cst_5 : f32 to vector<16x128xf32>
    %7 = arith.maximumf %5, %6 : vector<16x128xf32>
    %c0_6 = arith.constant 0 : index
    %c0_7 = arith.constant 0 : index
    %8 = vector.load %arg4[%c0_6, %c0_7] : memref<128x128xf32, #tpu.memory_space<vmem>>, vector<128x128xf32>
    %cst_8 = arith.constant dense<0.000000e+00> : vector<16x128xf32>
    %9 = tpu.matmul %7, %8, %cst_8 {dimension_numbers = #tpu.dot_dimension_numbers<[1], [0], [0], [1], [0, 0, 1, 1], [], []>} : vector<16x128xf32>, vector<128x128xf32>, vector<16x128xf32> -> vector<16x128xf32>
    %c0_9 = arith.constant 0 : index
    %c0_10 = arith.constant 0 : index
    %10 = vector.load %arg5[%c0_9, %c0_10] : memref<1x128xf32, #tpu.memory_space<vmem>>, vector<1x128xf32>
    %11 = vector.broadcast %10 : vector<1x128xf32> to vector<16x128xf32>
    %12 = arith.addf %9, %11 : vector<16x128xf32>
    %cst_11 = arith.constant 1.000000e-01 : f32
    %13 = vector.broadcast %cst_11 : f32 to vector<16x128xf32>
    %14 = arith.mulf %13, %12 : vector<16x128xf32>
    %15 = arith.maximumf %12, %14 : vector<16x128xf32>
    %c0_12 = arith.constant 0 : index
    %c0_13 = arith.constant 0 : index
    %16 = vector.load %arg6[%c0_12, %c0_13] : memref<128x128xf32, #tpu.memory_space<vmem>>, vector<128x128xf32>
    %cst_14 = arith.constant dense<0.000000e+00> : vector<16x128xf32>
    %17 = tpu.matmul %15, %16, %cst_14 {dimension_numbers = #tpu.dot_dimension_numbers<[1], [0], [0], [1], [0, 0, 1, 1], [], []>} : vector<16x128xf32>, vector<128x128xf32>, vector<16x128xf32> -> vector<16x128xf32>
    %c0_15 = arith.constant 0 : index
    %c0_16 = arith.constant 0 : index
    %18 = vector.load %arg7[%c0_15, %c0_16] : memref<1x128xf32, #tpu.memory_space<vmem>>, vector<1x128xf32>
    %19 = vector.broadcast %18 : vector<1x128xf32> to vector<16x128xf32>
    %20 = arith.addf %17, %19 : vector<16x128xf32>
    %c0_17 = arith.constant 0 : index
    %c0_18 = arith.constant 0 : index
    %21 = vector.load %arg8[%c0_17, %c0_18] : memref<16x128xf32, #tpu.memory_space<vmem>>, vector<16x128xf32>
    tpu.vector_store %arg8[%c0_17, %c0_18], %20 {strides = array<i32>} : memref<16x128xf32, #tpu.memory_space<vmem>>, vector<16x128xf32>,
    return
  }
  func.func @transform_0(%arg0: i32) -> (i32, i32) {
    %c0_i32 = arith.constant 0 : i32
    %c0_i32_0 = arith.constant 0 : i32
    return %arg0, %c0_i32 : i32, i32
  }
  func.func @transform_1(%arg0: i32) -> (i32, i32) {
    %c0_i32 = arith.constant 0 : i32
    %c0_i32_0 = arith.constant 0 : i32
    %c0_i32_1 = arith.constant 0 : i32
    return %c0_i32, %c0_i32_0 : i32, i32
  }
  func.func @transform_2(%arg0: i32) -> (i32, i32) {
    %c0_i32 = arith.constant 0 : i32
    %c0_i32_0 = arith.constant 0 : i32
    %c0_i32_1 = arith.constant 0 : i32
    return %c0_i32, %c0_i32_0 : i32, i32
  }
  func.func @transform_3(%arg0: i32) -> (i32, i32) {
    %c0_i32 = arith.constant 0 : i32
    %c0_i32_0 = arith.constant 0 : i32
    %c0_i32_1 = arith.constant 0 : i32
    return %c0_i32, %c0_i32_0 : i32, i32
  }
  func.func @transform_4(%arg0: i32) -> (i32, i32) {
    %c0_i32 = arith.constant 0 : i32
    %c0_i32_0 = arith.constant 0 : i32
    %c0_i32_1 = arith.constant 0 : i32
    return %c0_i32, %c0_i32_0 : i32, i32
  }
  func.func @transform_5(%arg0: i32) -> (i32, i32) {
    %c0_i32 = arith.constant 0 : i32
    %c0_i32_0 = arith.constant 0 : i32
    %c0_i32_1 = arith.constant 0 : i32
    return %c0_i32, %c0_i32_0 : i32, i32
  }
  func.func @transform_6(%arg0: i32) -> (i32, i32) {
    %c0_i32 = arith.constant 0 : i32
    %c0_i32_0 = arith.constant 0 : i32
    %c0_i32_1 = arith.constant 0 : i32
    return %c0_i32, %c0_i32_0 : i32, i32
  }
  func.func @transform_7(%arg0: i32) -> (i32, i32) {
    %c0_i32 = arith.constant 0 : i32
    %c0_i32_0 = arith.constant 0 : i32
    return %arg0, %c0_i32 : i32, i32
  }
}

</mosaic_0001>

<bundles_post_ra>
// kernel: mlp_forward.1
= control target key start
LH: loop header
LB: loop body
LE: loop exit
PB: predicated region body
PF: predicated region fallthrough
CT: control target
= control target key end

     0   :  { %s846_s0 = inlined_call_operand.vmem [shape: f32[16,128], index: 0, kind: input, shape index: {}]   ;;  %s847_s1 = inlined_call_operand.vmem [shape: f32[128,128], index: 1, kind: input, shape index: {}]   ;;  %s848_s2 = inlined_call_operand.vmem [shape: f32[1,128], index: 2, kind: input, shape index: {}]   ;;  %s849_s3 = inlined_call_operand.vmem [shape: f32[128,128], index: 3, kind: input, shape index: {}]   ;;  %s850_s4 = inlined_call_operand.vmem [shape: f32[1,128], index: 4, kind: input, shape index: {}]   ;;  %s851_s5 = inlined_call_operand.vmem [shape: f32[128,128], index: 5, kind: input, shape index: {}]   ;;  %s852_s6 = inlined_call_operand.vmem [shape: f32[1,128], index: 6, kind: input, shape index: {}]   ;;  %s853_s7 = inlined_call_operand.hbm [shape: f32[16,128], index: 7, kind: output, shape index: {}]  }
   0x1   :  { %v29_v0 = vld [vmem:[%s847_s1] sm:$0xff]  ;;  %v30_v1 = vld [vmem:[%s847_s1 + $0x8] sm:$0xff]  ;;  %v31_v2 = vld [vmem:[%s847_s1 + $0x10] sm:$0xff] }
   0x2   :  { %v509_v3 = vpack.c.bf16 %v30_v1, %v29_v0  ;;  %v32_v4 = vld [vmem:[%s847_s1 + $0x18] sm:$0xff]  ;;  %v33_v6 = vld [vmem:[%s847_s1 + $0x20] sm:$0xff]  ;;  %v34_v7 = vld [vmem:[%s847_s1 + $0x28] sm:$0xff] }
   0x3   :  { %v513_v5 = vpack.c.bf16 %v32_v4, %v31_v2  ;;  %v517_v8 = vpack.c.bf16 %v34_v7, %v33_v6  ;;  %v35_v9 = vld [vmem:[%s847_s1 + $0x30] sm:$0xff]  ;;  %v36_v10 = vld [vmem:[%s847_s1 + $0x38] sm:$0xff]  ;;  %v27_v11 = vld [vmem:[%s846_s0] sm:$0xff] }
   0x4   :  { %510 = vmatprep.subr.bf16.mxu0 %v509_v3  ;;  %436 = vmatprep.mubr.f32.mxu0 %v27_v11  ;;  %v129_v12 = vld [vmem:[%s849_s3] sm:$0xff]  ;;  %v130_v13 = vld [vmem:[%s849_s3 + $0x8] sm:$0xff]  ;;  %v131_v14 = vld [vmem:[%s849_s3 + $0x10] sm:$0xff]  ;;  %v521_v20 = vpack.c.bf16 %v36_v10, %v35_v9 }
   0x5   :  { %512 = vmatpush3.bf16.msra.mxu0 %v509_v3  ;;  %v541_v15 = vpack.c.bf16 %v130_v13, %v129_v12  ;;  %v132_v16 = vld [vmem:[%s849_s3 + $0x18] sm:$0xff]  ;;  %v133_v18 = vld [vmem:[%s849_s3 + $0x20] sm:$0xff]  ;;  %v134_v19 = vld [vmem:[%s849_s3 + $0x28] sm:$0xff] }
   0x6   :  { %514 = vmatprep.subr.bf16.mxu0 %v513_v5  ;;  %v545_v17 = vpack.c.bf16 %v132_v16, %v131_v14  ;;  %v37_v21 = vld [vmem:[%s847_s1 + $0x40] sm:$0xff]  ;;  %v38_v22 = vld [vmem:[%s847_s1 + $0x48] sm:$0xff] }
   0x7   :  { %542 = vmatprep.subr.bf16.mxu1 %v541_v15 }
   0x8   :  { %544 = vmatpush3.bf16.msra.mxu1 %v541_v15 }
   0x9   :  { %516 = vmatpush3.bf16.msra.mxu0 %v513_v5 }
   0xa   :  { %518 = vmatprep.subr.bf16.mxu0 %v517_v8 }
   0xb   :  { %12 = vsyncpa [#allocation3], 0  ;;  %546 = vmatprep.subr.bf16.mxu1 %v545_v17  ;;  %v549_v23 = vpack.c.bf16 %v134_v19, %v133_v18  ;;  %v135_v24 = vld [vmem:[%s849_s3 + $0x30] sm:$0xff]  ;;  %v136_v25 = vld [vmem:[%s849_s3 + $0x38] sm:$0xff]  ;;  %v525_v26 = vpack.c.bf16 %v38_v22, %v37_v21 }
   0xc   :  { %v39_v27 = vld [vmem:[%s847_s1 + $0x50] sm:$0xff]  ;;  %v40_v28 = vld [vmem:[%s847_s1 + $0x58] sm:$0xff]  ;;  %548 = vmatpush3.bf16.msra.mxu1 %v545_v17  ;;  %v553_v29 = vpack.c.bf16 %v136_v25, %v135_v24  ;;  %v137_v30 = vld [vmem:[%s849_s3 + $0x40] sm:$0xff] }
   0xd   :  { %520 = vmatpush3.bf16.msra.mxu0 %v517_v8  ;;  %550 = vmatprep.subr.bf16.mxu1 %v549_v23  ;;  %v138_v31 = vld [vmem:[%s849_s3 + $0x48] sm:$0xff]  ;;  %v529_v32 = vpack.c.bf16 %v40_v28, %v39_v27  ;;  %v41_v33 = vld [vmem:[%s847_s1 + $0x60] sm:$0xff]  ;;  %v139_v36 = vld [vmem:[%s849_s3 + $0x50] sm:$0xff] }
   0xe   :  { %522 = vmatprep.subr.bf16.mxu0 %v521_v20  ;;  %v42_v34 = vld [vmem:[%s847_s1 + $0x68] sm:$0xff]  ;;  %v557_v35 = vpack.c.bf16 %v138_v31, %v137_v30  ;;  %v140_v37 = vld [vmem:[%s849_s3 + $0x58] sm:$0xff]  ;;  %v43_v39 = vld [vmem:[%s847_s1 + $0x70] sm:$0xff] }
   0xf   :  { %v533_v38 = vpack.c.bf16 %v42_v34, %v41_v33  ;;  %v44_v40 = vld [vmem:[%s847_s1 + $0x78] sm:$0xff]  ;;  %v561_v41 = vpack.c.bf16 %v140_v37, %v139_v36  ;;  %v141_v42 = vld [vmem:[%s849_s3 + $0x60] sm:$0xff]  ;;  %v142_v43 = vld [vmem:[%s849_s3 + $0x68] sm:$0xff] }
  0x10   :  { %552 = vmatpush3.bf16.msra.mxu1 %v549_v23  ;;  %v537_v44 = vpack.c.bf16 %v44_v40, %v43_v39  ;;  %v565_v45 = vpack.c.bf16 %v142_v43, %v141_v42  ;;  %v28_v46 = vld [vmem:[%s846_s0 + $0x8] sm:$0xff]  ;;  %v143_v47 = vld [vmem:[%s849_s3 + $0x70] sm:$0xff]  ;;  %v144_v48 = vld [vmem:[%s849_s3 + $0x78] sm:$0xff] }
  0x11   :  { %524 = vmatpush3.bf16.msra.mxu0 %v521_v20  ;;  %554 = vmatprep.subr.bf16.mxu1 %v553_v29  ;;  %v569_v49 = vpack.c.bf16 %v144_v48, %v143_v47  ;;  %v231_v50 = vld [vmem:[%s851_s5] sm:$0xff]  ;;  %v232_v51 = vld [vmem:[%s851_s5 + $0x8] sm:$0xff]  ;;  %v233_v52 = vld [vmem:[%s851_s5 + $0x10] sm:$0xff] }
  0x12   :  { %526 = vmatprep.subr.bf16.mxu0 %v525_v26  ;;  %v573_v53 = vpack.c.bf16 %v232_v51, %v231_v50  ;;  %v234_v54 = vld [vmem:[%s851_s5 + $0x18] sm:$0xff]  ;;  %v235_v56 = vld [vmem:[%s851_s5 + $0x20] sm:$0xff]  ;;  %v236_v57 = vld [vmem:[%s851_s5 + $0x28] sm:$0xff] }
  0x13   :  { %v577_v55 = vpack.c.bf16 %v234_v54, %v233_v52  ;;  %v581_v58 = vpack.c.bf16 %v236_v57, %v235_v56  ;;  %v237_v59 = vld [vmem:[%s851_s5 + $0x30] sm:$0xff]  ;;  %v238_v60 = vld [vmem:[%s851_s5 + $0x38] sm:$0xff]  ;;  %v239_v62 = vld [vmem:[%s851_s5 + $0x40] sm:$0xff] }
  0x14   :  { %556 = vmatpush3.bf16.msra.mxu1 %v553_v29  ;;  %v585_v61 = vpack.c.bf16 %v238_v60, %v237_v59  ;;  %v240_v63 = vld [vmem:[%s851_s5 + $0x48] sm:$0xff]  ;;  %v241_v1 = vld [vmem:[%s851_s5 + $0x50] sm:$0xff]  ;;  %v242_v2 = vld [vmem:[%s851_s5 + $0x58] sm:$0xff] }
  0x15   :  { %528 = vmatpush3.bf16.msra.mxu0 %v525_v26  ;;  %558 = vmatprep.subr.bf16.mxu1 %v557_v35  ;;  %v589_v0 = vpack.c.bf16 %v240_v63, %v239_v62  ;;  %v593_v3 = vpack.c.bf16 %v242_v2, %v241_v1  ;;  %v347_v4 = vld [vmem:[%s848_s2] ss:$0 sm:$0xff]  ;;  %v244_v12 = vld [vmem:[%s851_s5 + $0x68] sm:$0xff]  ;;  %v245_v14 = vld [vmem:[%s851_s5 + $0x70] sm:$0xff] }
  0x16   :  { %530 = vmatprep.subr.bf16.mxu0 %v529_v32  ;;  %v243_v11 = vld [vmem:[%s851_s5 + $0x60] sm:$0xff]  ;;  %v246_v15 = vld [vmem:[%s851_s5 + $0x78] sm:$0xff]  ;;  %s632_s5 = smov [#allocation2]  }
  0x17   :  { %v597_v13 = vpack.c.bf16 %v244_v12, %v243_v11  ;;  %v601_v16 = vpack.c.bf16 %v246_v15, %v245_v14  ;;  %v348_v17 = vld [vmem:[%s850_s4] ss:$0 sm:$0xff]  ;;  %s336_s8 = sshll.u32 %s632_s5, 4  ;;  %s337_s8 = int_to_ptr.vmem [resolvable:$true] %s336_s8 }
  0x18   :  { %560 = vmatpush3.bf16.msra.mxu1 %v557_v35  ;;  %v349_v26 = vld [vmem:[%s852_s6] ss:$0 sm:$0xff]  ;;  %s608_s4 = scalar_lea.vmem %s337_s8, 256  ;;  %p613_p1 = scmp.lt.s32.totalorder %s337_s8, %s337_s8 }
  0x19   :  { %532 = vmatpush3.bf16.msra.mxu0 %v529_v32  ;;  %562 = vmatprep.subr.bf16.mxu1 %v561_v41  ;;  %p609_p0 = scmp.ne.s32.totalorder %s337_s8, %s608_s4  ;;  %p614_p2 = scmp.lt.s32.totalorder %s608_s4, %s608_s4 }
  0x1a   :  { %534 = vmatprep.subr.bf16.mxu0 %v533_v38 }
  0x1b   :  { %p615_p3 = por %p614_p2, %p613_p1 }
  0x1c   :  { %564 = vmatpush3.bf16.msra.mxu1 %v561_v41 }
  0x1d   :  { %536 = vmatpush3.bf16.msra.mxu0 %v533_v38  ;;  %566 = vmatprep.subr.bf16.mxu1 %v565_v45  ;;  %p616_p4 = pnand %p615_p3, %p609_p0 }
  0x1e   :  { %538 = vmatprep.subr.bf16.mxu0 %v537_v44 }
  0x20   :  { %568 = vmatpush3.bf16.msra.mxu1 %v565_v45 }
  0x21   :  { %540 = vmatpush3.bf16.msra.mxu0 %v537_v44  ;;  %570 = vmatprep.subr.bf16.mxu1 %v569_v49 }
  0x22   :  { %574 = vmatprep.subr.bf16.mxu0 %v573_v53 }
  0x24   :  { %437 = vmatmul.mubr.f32.vlgmr.msra.gmra.mrb[0].mxu0 %v28_v46  ;;  %572 = vmatpush3.bf16.msra.mxu1 %v569_v49 }
  0x25   :  { %576 = vmatpush3.bf16.msra.mxu0 %v573_v53 }
  0x26   :  { %578 = vmatprep.subr.bf16.mxu0 %v577_v55 }
  0x29   :  { %580 = vmatpush3.bf16.msra.mxu0 %v577_v55 }
  0x2a   :  { %582 = vmatprep.subr.bf16.mxu0 %v581_v58 }
  0x2d   :  { %584 = vmatpush3.bf16.msra.mxu0 %v581_v58 }
  0x2e   :  { %586 = vmatprep.subr.bf16.mxu0 %v585_v61 }
  0x31   :  { %588 = vmatpush3.bf16.msra.mxu0 %v585_v61 }
  0x32   :  { %590 = vmatprep.subr.bf16.mxu0 %v589_v0 }
  0x35   :  { %592 = vmatpush3.bf16.msra.mxu0 %v589_v0 }
  0x36   :  { %594 = vmatprep.subr.bf16.mxu0 %v593_v3 }
  0x39   :  { %596 = vmatpush3.bf16.msra.mxu0 %v593_v3 }
  0x3a   :  { %598 = vmatprep.subr.bf16.mxu0 %v597_v13 }
  0x3d   :  { %600 = vmatpush3.bf16.msra.mxu0 %v597_v13 }
  0x3e   :  { %602 = vmatprep.subr.bf16.mxu0 %v601_v16 }
  0x41   :  { %604 = vmatpush3.bf16.msra.mxu0 %v601_v16 }
  0xf7   :  { %v438_v5 = vpop.f32.mrb[0].mxu0 }
  0xf8   :  { %v124_v6 = vadd.f32 %v438_v5, %v347_v4  ;;  %v118_v7 = vpop.f32.mrb[1].mxu0 }
  0xf9   :  { %v119_v8 = vadd.f32 %v347_v4, %v118_v7 }
  0xfa   :  { %v128_v10 = vmax.f32 %v124_v6, 0.0 }
  0xfb   :  { %v127_v9 = vmax.f32 %v119_v8, 0.0 }
  0xfd   :  { %471 = vmatprep.mubr.f32.mxu1 %v127_v9 }
  0xfe   :  { %472 = vmatmul.mubr.f32.vlgmr.msra.gmra.mrb[0].mxu1 %v128_v10 }
 0x1d1   :  { %v473_v18 = vpop.f32.mrb[0].mxu1 }
 0x1d2   :  { %v224_v19 = vadd.f32 %v473_v18, %v348_v17  ;;  %v218_v20 = vpop.f32.mrb[1].mxu1 }
 0x1d3   :  { %v219_v21 = vadd.f32 %v348_v17, %v218_v20 }
 0x1d4   :  { %v228_v22 = vmul.f32 0.1, %v224_v19 }
 0x1d5   :  { %v227_v23 = vmul.f32 0.1, %v219_v21 }
 0x1d6   :  { %v230_v25 = vmax.f32 %v224_v19, %v228_v22 }
 0x1d7   :  { %v229_v24 = vmax.f32 %v219_v21, %v227_v23 }
 0x1d9   :  { %506 = vmatprep.mubr.f32.mxu0 %v229_v24 }
 0x1da   :  { %507 = vmatmul.mubr.f32.vlgmr.msra.gmra.mrb[2].mxu0 %v230_v25 }
 0x2ad   :  { %v508_v27 = vpop.f32.mrb[2].mxu0 }
 0x2ae   :  { %v326_v28 = vadd.f32 %v508_v27, %v349_v26  ;;  %v320_v29 = vpop.f32.mrb[3].mxu0 }
 0x2af   :  { %v321_v30 = vadd.f32 %v349_v26, %v320_v29 }
 0x2b0   :  { %330 = vst [vmem:[#allocation2 + $0x8] sm:$0xff] %v326_v28 }
 0x2b1   :  { %329 = vst [vmem:[#allocation2] sm:$0xff] %v321_v30 }
 0x2b2   :  { %619 = shalt.err (!%p616_p4)
}
 0x2b3   :  { %s620_s6 = scalar_lea.hbm %s853_s7, 256 }
 0x2b4   :  { %p621_p5 = scmp.ne.s32.totalorder %s853_s7, %s620_s6  ;;  %p624_p6 = scmp.lt.u32.totalorder %s620_s6, %s853_s7 }
 0x2b6   :  { %p626_p7 = pnand %p624_p6, %p621_p5 }
 0x2b8   :  { %629 = shalt.err (!%p626_p7)
}
 0x2b9   :  { %s633_s15 = smov 128   ;;  %s634_s16 = smov 8  }
 0x2ba   :  { %342 = dma.vmem_to_hbm [thread:$0]  %s337_s8, 256, %s853_s7, [#allocation3], %s633_s15, %s633_s15, %s634_s16  }
 0x2bb   :  { %630 = dma.done.wait [#allocation3], 256  }
 0x2bc   :  { %631 = vsyncadd [#allocation3], 4294967040 }
 0x2bd   :  { %346 = vsyncpa [#allocation3], 1 }

</bundles_post_ra>
